<compile_context>
chip_gen: v5e
topology: v5e:2x2
jax: 0.10.0
libtpu: 0.0.40
codegen_flags: <defaults>
</compile_context>

<pallas_src>
import functools

import jax
import jax.numpy as jnp
import numpy as np
from jax.experimental import pallas as pl
from jax.experimental.pallas import tpu as pltpu

_LANES = 128


def _round_up(x, m):
    return ((x + m - 1) // m) * m


def _diou_mse_kernel(data_ref, o_ref, *, n_boxes, tile_r, lanes, c_mse, c_diou, eps):
    f32 = jnp.float32
    # SoA coordinate planes, each (tile_r, lanes). Leading-axis indexing of the block
    # is just a VMEM base-address offset — no lane/sublane shuffles.
    sx0 = data_ref[0].astype(f32)
    sy0 = data_ref[1].astype(f32)
    sx1 = data_ref[2].astype(f32)
    sy1 = data_ref[3].astype(f32)
    tx0 = data_ref[4].astype(f32)
    ty0 = data_ref[5].astype(f32)
    tx1 = data_ref[6].astype(f32)
    ty1 = data_ref[7].astype(f32)

    # ---- MSE branch: per-box sum of squared coord diffs (zero padding -> exact 0) ----
    d0 = sx0 - tx0
    d1 = sy0 - ty0
    d2 = sx1 - tx1
    d3 = sy1 - ty1
    sq = d0 * d0 + d1 * d1 + d2 * d2 + d3 * d3                     # (tile_r, lanes)

    # ---- DIoU branch ----
    area1 = jnp.abs((sx1 - sx0) * (sy1 - sy0))
    area2 = jnp.abs((tx1 - tx0) * (ty1 - ty0))
    iw = jnp.maximum(jnp.minimum(sx1, tx1) - jnp.maximum(sx0, tx0), 0.0)
    ih = jnp.maximum(jnp.minimum(sy1, ty1) - jnp.maximum(sy0, ty0), 0.0)
    inter = iw * ih
    union = jnp.maximum(area1 + area2 - inter, 0.0)

    cdx = (tx1 + tx0 - sx1 - sx0) * 0.5                            # center_x2 - center_x1
    cdy = (ty1 + ty0 - sy1 - sy0) * 0.5
    ow = jnp.maximum(sx1, tx1) - jnp.minimum(sx0, tx0)
    oh = jnp.maximum(sy1, ty1) - jnp.minimum(sy0, ty0)
    inter_diag = jnp.maximum(jnp.sqrt(cdx * cdx + cdy * cdy), 1e-6)
    outer_diag = jnp.maximum(jnp.sqrt(ow * ow + oh * oh), 1e-6)

    # Divides -> exact EUP reciprocal + VPU multiply (approx=False keeps 1e-6 accuracy).
    dious = (1.0
             - inter * pl.reciprocal(union + eps, approx=False)
             + inter_diag * pl.reciprocal(outer_diag, approx=False))
    dious = jnp.clip(dious, -1.0, 1.0)

    # Mask padded boxes (box index >= n_boxes); MSE padding is already exactly zero.
    row = jax.lax.broadcasted_iota(jnp.int32, (tile_r, lanes), 0)
    lane = jax.lax.broadcasted_iota(jnp.int32, (tile_r, lanes), 1)
    box_id = (pl.program_id(0) * tile_r + row) * lanes + lane
    dious = jnp.where(box_id < n_boxes, dious, 0.0)

    # The loss is linear in both sums -> pre-scaled combined per-box contribution.
    contrib = c_mse * sq + c_diou * dious                          # (tile_r, lanes)

    # Reduce only over the row axis; defer the tiny cross-lane / cross-tile sum to the
    # wrapper. Lane-dense (1, 1, 128) store per grid step.
    o_ref[0] = jnp.sum(contrib, axis=0, keepdims=True)


def _reference_loss(score, target, alpha=0.25, delta=0.01, eps=1e-6):
    """Pure-XLA reference (and small-input fallback), mirrors the PyTorch module."""
    s = score.astype(jnp.float32)
    t = target.astype(jnp.float32)
    sx0, sy0, sx1, sy1 = s[..., 0], s[..., 1], s[..., 2], s[..., 3]
    tx0, ty0, tx1, ty1 = t[..., 0], t[..., 1], t[..., 2], t[..., 3]
    area1 = jnp.abs((sx1 - sx0) * (sy1 - sy0))
    area2 = jnp.abs((tx1 - tx0) * (ty1 - ty0))
    iw = jnp.maximum(jnp.minimum(sx1, tx1) - jnp.maximum(sx0, tx0), 0.0)
    ih = jnp.maximum(jnp.minimum(sy1, ty1) - jnp.maximum(sy0, ty0), 0.0)
    inter = iw * ih
    union = jnp.maximum(area1 + area2 - inter, 0.0)
    cdx = (tx1 + tx0 - sx1 - sx0) * 0.5
    cdy = (ty1 + ty0 - sy1 - sy0) * 0.5
    ow = jnp.maximum(sx1, tx1) - jnp.minimum(sx0, tx0)
    oh = jnp.maximum(sy1, ty1) - jnp.minimum(sy0, ty0)
    inter_diag = jnp.maximum(jnp.sqrt(cdx * cdx + cdy * cdy), 1e-6)
    outer_diag = jnp.maximum(jnp.sqrt(ow * ow + oh * oh), 1e-6)
    dious = 1.0 - inter / (union + eps) + inter_diag / outer_diag
    diou_loss = jnp.mean(jnp.clip(dious, -1.0, 1.0))   # == (sum_D clamp / D).mean()
    mse = jnp.mean((s - t) ** 2)
    return delta * alpha * mse + (1.0 - alpha) * diou_loss


def multiclass_iou_ce_loss(score, target, alpha=0.25, delta=0.01, eps=1e-6,
                           *, max_tile_rows=512, force_pallas=False):
    """score, target: (B, D, 4) boxes (x0, y0, x1, y1). Returns the scalar loss."""
    assert score.shape == target.shape and score.shape[-1] == 4
    B, D, _ = score.shape
    n = B * D

    # Tiny inputs: launch + per-step overhead dominates; use the fused XLA path.
    if not force_pallas and n < 4096:
        return _reference_loss(score, target, alpha, delta, eps)

    # AoS (B, D, 4) -> lane-dense SoA (8, rows_pad, 128): planes 0-3 score, 4-7 target.
    coords = jnp.concatenate(
        [score.reshape(n, 4), target.reshape(n, 4)], axis=1).T      # (8, n), input dtype

    rows = pl.cdiv(n, _LANES)
    tile_r = min(_round_up(max_tile_rows, 8), _round_up(rows, 8))
    rows_pad = _round_up(rows, tile_r)
    n_pad = rows_pad * _LANES
    coords = jnp.pad(coords, ((0, 0), (0, n_pad - n)))              # zero padding
    data = coords.reshape(8, rows_pad, _LANES)
    num_tiles = rows_pad // tile_r

    kernel = functools.partial(
        _diou_mse_kernel,
        n_boxes=n, tile_r=tile_r, lanes=_LANES,
        c_mse=float(delta * alpha / (n * 4)),
        c_diou=float((1.0 - alpha) / n),
        eps=float(eps),
    )

    partials = pl.pallas_call(
        kernel,
        out_shape=jax.ShapeDtypeStruct((num_tiles, 1, _LANES), jnp.float32),
        grid_spec=pltpu.PrefetchScalarGridSpec(
            num_scalar_prefetch=0,
            grid=(num_tiles,),
            in_specs=[pl.BlockSpec((8, tile_r, _LANES), lambda i: (0, i, 0))],
            out_specs=pl.BlockSpec((1, 1, _LANES), lambda i: (i, 0, 0)),
        ),
        compiler_params=pltpu.CompilerParams(
            # Per-tile partial outputs -> no carried accumulator -> the grid axis is
            # safe to shard across TensorCores (v7x megacore); neutral on v5e/v6e.
            dimension_semantics=("parallel",),
            # Double-buffered input block = 2 * 8 * tile_r * 128 * 4 B (4 MiB at
            # tile_r=512) — within every generation's scoped-VMEM budget.
            vmem_limit_bytes=32 * 1024 * 1024,
        ),
    )(data)

    return jnp.sum(partials)


if __name__ == "__main__":
    alpha, delta = 0.25, 0.01
    key = jax.random.PRNGKey(0)
    k1, k2, k3, k4, k5, k6, k7, k8 = jax.random.split(key, 8)

    def make_boxes(ka, kb, b, d):
        xy = jax.random.uniform(ka, (b, d, 2), dtype=jnp.float32)
        wh = jax.random.uniform(kb, (b, d, 2), dtype=jnp.float32,
                                minval=0.05, maxval=0.5)
        return jnp.concatenate([xy, xy + wh], axis=-1)   # (b, d, 4) = (x0, y0, x1, y1)

    # Small single-tile case (400 boxes -> padded to 1024 slots, exercises the mask).
    B, D = 2, 200
    score = make_boxes(k1, k2, B, D)
    target = make_boxes(k3, k4, B, D)
    loss = jax.block_until_ready(
        multiclass_iou_ce_loss(score, target, alpha, delta, force_pallas=True))
    ref = _reference_loss(score, target, alpha, delta)
    np.testing.assert_allclose(np.asarray(loss), np.asarray(ref), rtol=1e-4, atol=1e-6)

    # Multi-tile case: 4000 boxes, max_tile_rows=8 -> 4 grid steps of (8, 8, 128) tiles,
    # exercising the per-tile partial-sum path and the padded last tile.
    B2, D2 = 4, 1000
    score2 = make_boxes(k5, k6, B2, D2)
    target2 = make_boxes(k7, k8, B2, D2)
    loss2 = jax.block_until_ready(
        multiclass_iou_ce_loss(score2, target2, alpha, delta,
                               max_tile_rows=8, force_pallas=True))
    ref2 = _reference_loss(score2, target2, alpha, delta)
    np.testing.assert_allclose(np.asarray(loss2), np.asarray(ref2), rtol=1e-4, atol=1e-6)

    print("KERNEL_OK")
</pallas_src>

<mosaic_0001>
module attributes {stable_mosaic.version = 11 : i64} {
  func.func @_diou_mse_kernel(%arg0: i32, %arg1: memref<8x8x128xf32, #tpu.memory_space<vmem>>, %arg2: memref<1x1x128xf32, #tpu.memory_space<vmem>>) attributes {dimension_semantics = [#tpu.dimension_semantics<parallel>], iteration_bounds = array<i64: 1>, scalar_prefetch = 0 : i64, scratch_operands = 0 : i64, tpu.core_type = #tpu.core_type<tc>, window_params = [{transform_indices = @transform_0, window_bounds = array<i64: 8, 8, 128>}, {transform_indices = @transform_1, window_bounds = array<i64: 1, 1, 128>}]} {
    %c0 = arith.constant 0 : index
    %c0_0 = arith.constant 0 : index
    %c0_1 = arith.constant 0 : index
    %0 = vector.load %arg1[%c0, %c0_0, %c0_1] : memref<8x8x128xf32, #tpu.memory_space<vmem>>, vector<1x8x128xf32>
    %1 = vector.shape_cast %0 : vector<1x8x128xf32> to vector<8x128xf32>
    %c1 = arith.constant 1 : index
    %c0_2 = arith.constant 0 : index
    %c0_3 = arith.constant 0 : index
    %2 = vector.load %arg1[%c1, %c0_2, %c0_3] : memref<8x8x128xf32, #tpu.memory_space<vmem>>, vector<1x8x128xf32>
    %3 = vector.shape_cast %2 : vector<1x8x128xf32> to vector<8x128xf32>
    %c2 = arith.constant 2 : index
    %c0_4 = arith.constant 0 : index
    %c0_5 = arith.constant 0 : index
    %4 = vector.load %arg1[%c2, %c0_4, %c0_5] : memref<8x8x128xf32, #tpu.memory_space<vmem>>, vector<1x8x128xf32>
    %5 = vector.shape_cast %4 : vector<1x8x128xf32> to vector<8x128xf32>
    %c3 = arith.constant 3 : index
    %c0_6 = arith.constant 0 : index
    %c0_7 = arith.constant 0 : index
    %6 = vector.load %arg1[%c3, %c0_6, %c0_7] : memref<8x8x128xf32, #tpu.memory_space<vmem>>, vector<1x8x128xf32>
    %7 = vector.shape_cast %6 : vector<1x8x128xf32> to vector<8x128xf32>
    %c4 = arith.constant 4 : index
    %c0_8 = arith.constant 0 : index
    %c0_9 = arith.constant 0 : index
    %8 = vector.load %arg1[%c4, %c0_8, %c0_9] : memref<8x8x128xf32, #tpu.memory_space<vmem>>, vector<1x8x128xf32>
    %9 = vector.shape_cast %8 : vector<1x8x128xf32> to vector<8x128xf32>
    %c5 = arith.constant 5 : index
    %c0_10 = arith.constant 0 : index
    %c0_11 = arith.constant 0 : index
    %10 = vector.load %arg1[%c5, %c0_10, %c0_11] : memref<8x8x128xf32, #tpu.memory_space<vmem>>, vector<1x8x128xf32>
    %11 = vector.shape_cast %10 : vector<1x8x128xf32> to vector<8x128xf32>
    %c6 = arith.constant 6 : index
    %c0_12 = arith.constant 0 : index
    %c0_13 = arith.constant 0 : index
    %12 = vector.load %arg1[%c6, %c0_12, %c0_13] : memref<8x8x128xf32, #tpu.memory_space<vmem>>, vector<1x8x128xf32>
    %13 = vector.shape_cast %12 : vector<1x8x128xf32> to vector<8x128xf32>
    %c7 = arith.constant 7 : index
    %c0_14 = arith.constant 0 : index
    %c0_15 = arith.constant 0 : index
    %14 = vector.load %arg1[%c7, %c0_14, %c0_15] : memref<8x8x128xf32, #tpu.memory_space<vmem>>, vector<1x8x128xf32>
    %15 = vector.shape_cast %14 : vector<1x8x128xf32> to vector<8x128xf32>
    %16 = arith.subf %1, %9 : vector<8x128xf32>
    %17 = arith.subf %3, %11 : vector<8x128xf32>
    %18 = arith.subf %5, %13 : vector<8x128xf32>
    %19 = arith.subf %7, %15 : vector<8x128xf32>
    %20 = arith.mulf %16, %16 : vector<8x128xf32>
    %21 = arith.mulf %17, %17 : vector<8x128xf32>
    %22 = arith.addf %20, %21 : vector<8x128xf32>
    %23 = arith.mulf %18, %18 : vector<8x128xf32>
    %24 = arith.addf %22, %23 : vector<8x128xf32>
    %25 = arith.mulf %19, %19 : vector<8x128xf32>
    %26 = arith.addf %24, %25 : vector<8x128xf32>
    %27 = arith.subf %5, %1 : vector<8x128xf32>
    %28 = arith.subf %7, %3 : vector<8x128xf32>
    %29 = arith.mulf %27, %28 : vector<8x128xf32>
    %30 = math.absf %29 : vector<8x128xf32>
    %31 = arith.subf %13, %9 : vector<8x128xf32>
    %32 = arith.subf %15, %11 : vector<8x128xf32>
    %33 = arith.mulf %31, %32 : vector<8x128xf32>
    %34 = math.absf %33 : vector<8x128xf32>
    %35 = arith.minimumf %5, %13 : vector<8x128xf32>
    %36 = arith.maximumf %1, %9 : vector<8x128xf32>
    %37 = arith.subf %35, %36 : vector<8x128xf32>
    %cst = arith.constant 0.000000e+00 : f32
    %38 = vector.broadcast %cst : f32 to vector<8x128xf32>
    %39 = arith.maximumf %37, %38 : vector<8x128xf32>
    %40 = arith.minimumf %7, %15 : vector<8x128xf32>
    %41 = arith.maximumf %3, %11 : vector<8x128xf32>
    %42 = arith.subf %40, %41 : vector<8x128xf32>
    %cst_16 = arith.constant 0.000000e+00 : f32
    %43 = vector.broadcast %cst_16 : f32 to vector<8x128xf32>
    %44 = arith.maximumf %42, %43 : vector<8x128xf32>
    %45 = arith.mulf %39, %44 : vector<8x128xf32>
    %46 = arith.addf %30, %34 : vector<8x128xf32>
    %47 = arith.subf %46, %45 : vector<8x128xf32>
    %cst_17 = arith.constant 0.000000e+00 : f32
    %48 = vector.broadcast %cst_17 : f32 to vector<8x128xf32>
    %49 = arith.maximumf %47, %48 : vector<8x128xf32>
    %50 = arith.addf %13, %9 : vector<8x128xf32>
    %51 = arith.subf %50, %5 : vector<8x128xf32>
    %52 = arith.subf %51, %1 : vector<8x128xf32>
    %cst_18 = arith.constant 5.000000e-01 : f32
    %53 = vector.broadcast %cst_18 : f32 to vector<8x128xf32>
    %54 = arith.mulf %52, %53 : vector<8x128xf32>
    %55 = arith.addf %15, %11 : vector<8x128xf32>
    %56 = arith.subf %55, %7 : vector<8x128xf32>
    %57 = arith.subf %56, %3 : vector<8x128xf32>
    %cst_19 = arith.constant 5.000000e-01 : f32
    %58 = vector.broadcast %cst_19 : f32 to vector<8x128xf32>
    %59 = arith.mulf %57, %58 : vector<8x128xf32>
    %60 = arith.maximumf %5, %13 : vector<8x128xf32>
    %61 = arith.minimumf %1, %9 : vector<8x128xf32>
    %62 = arith.subf %60, %61 : vector<8x128xf32>
    %63 = arith.maximumf %7, %15 : vector<8x128xf32>
    %64 = arith.minimumf %3, %11 : vector<8x128xf32>
    %65 = arith.subf %63, %64 : vector<8x128xf32>
    %66 = arith.mulf %54, %54 : vector<8x128xf32>
    %67 = arith.mulf %59, %59 : vector<8x128xf32>
    %68 = arith.addf %66, %67 : vector<8x128xf32>
    %69 = math.sqrt %68 : vector<8x128xf32>
    %cst_20 = arith.constant 9.99999997E-7 : f32
    %70 = vector.broadcast %cst_20 : f32 to vector<8x128xf32>
    %71 = arith.maximumf %69, %70 : vector<8x128xf32>
    %72 = arith.mulf %62, %62 : vector<8x128xf32>
    %73 = arith.mulf %65, %65 : vector<8x128xf32>
    %74 = arith.addf %72, %73 : vector<8x128xf32>
    %75 = math.sqrt %74 : vector<8x128xf32>
    %cst_21 = arith.constant 9.99999997E-7 : f32
    %76 = vector.broadcast %cst_21 : f32 to vector<8x128xf32>
    %77 = arith.maximumf %75, %76 : vector<8x128xf32>
    %cst_22 = arith.constant 9.99999997E-7 : f32
    %78 = vector.broadcast %cst_22 : f32 to vector<8x128xf32>
    %79 = arith.addf %49, %78 : vector<8x128xf32>
    %80 = tpu.reciprocal %79 : vector<8x128xf32> -> vector<8x128xf32>
    %81 = arith.mulf %45, %80 : vector<8x128xf32>
    %cst_23 = arith.constant 1.000000e+00 : f32
    %82 = vector.broadcast %cst_23 : f32 to vector<8x128xf32>
    %83 = arith.subf %82, %81 : vector<8x128xf32>
    %84 = tpu.reciprocal %77 : vector<8x128xf32> -> vector<8x128xf32>
    %85 = arith.mulf %71, %84 : vector<8x128xf32>
    %86 = arith.addf %83, %85 : vector<8x128xf32>
    %cst_24 = arith.constant -1.000000e+00 : f32
    %cst_25 = arith.constant 1.000000e+00 : f32
    %87 = vector.broadcast %cst_24 : f32 to vector<8x128xf32>
    %88 = arith.maximumf %87, %86 : vector<8x128xf32>
    %89 = vector.broadcast %cst_25 : f32 to vector<8x128xf32>
    %90 = arith.minimumf %89, %88 : vector<8x128xf32>
    %91 = tpu.iota {dimensions = array<i32: 0>} : vector<8x128xi32>
    %92 = tpu.iota {dimensions = array<i32: 1>} : vector<8x128xi32>
    %c8_i32 = arith.constant 8 : i32
    %93 = arith.muli %arg0, %c8_i32 : i32
    %94 = vector.broadcast %93 : i32 to vector<8x128xi32>
    %95 = arith.addi %94, %91 : vector<8x128xi32>
    %c128_i32 = arith.constant 128 : i32
    %96 = vector.broadcast %c128_i32 : i32 to vector<8x128xi32>
    %97 = arith.muli %95, %96 : vector<8x128xi32>
    %98 = arith.addi %97, %92 : vector<8x128xi32>
    %c400_i32 = arith.constant 400 : i32
    %99 = vector.broadcast %c400_i32 : i32 to vector<8x128xi32>
    %100 = arith.cmpi slt, %98, %99 : vector<8x128xi32>
    %cst_26 = arith.constant 0.000000e+00 : f32
    %101 = vector.broadcast %cst_26 : f32 to vector<8x128xf32>
    %102 = arith.select %100, %90, %101 : vector<8x128xi1>, vector<8x128xf32>
    %cst_27 = arith.constant 1.562500e-06 : f32
    %103 = vector.broadcast %cst_27 : f32 to vector<8x128xf32>
    %104 = arith.mulf %103, %26 : vector<8x128xf32>
    %cst_28 = arith.constant 1.875000e-03 : f32
    %105 = vector.broadcast %cst_28 : f32 to vector<8x128xf32>
    %106 = arith.mulf %105, %102 : vector<8x128xf32>
    %107 = arith.addf %104, %106 : vector<8x128xf32>
    %cst_29 = arith.constant dense<0.000000e+00> : vector<128xf32>
    %108 = vector.multi_reduction <add>, %107, %cst_29 [0] : vector<8x128xf32> to vector<128xf32>
    %109 = vector.shape_cast %108 : vector<128xf32> to vector<1x128xf32>
    %c0_30 = arith.constant 0 : index
    %c0_31 = arith.constant 0 : index
    %c0_32 = arith.constant 0 : index
    %110 = vector.load %arg2[%c0_30, %c0_31, %c0_32] : memref<1x1x128xf32, #tpu.memory_space<vmem>>, vector<1x1x128xf32>
    %111 = vector.shape_cast %110 : vector<1x1x128xf32> to vector<1x128xf32>
    %112 = vector.shape_cast %109 : vector<1x128xf32> to vector<1x1x128xf32>
    tpu.vector_store %arg2[%c0_30, %c0_31, %c0_32], %112 {strides = array<i32>} : memref<1x1x128xf32, #tpu.memory_space<vmem>>, vector<1x1x128xf32>,
    return
  }
  func.func @transform_0(%arg0: i32) -> (i32, i32, i32) {
    %c0_i32 = arith.constant 0 : i32
    %c0_i32_0 = arith.constant 0 : i32
    %c0_i32_1 = arith.constant 0 : i32
    return %c0_i32, %arg0, %c0_i32_0 : i32, i32, i32
  }
  func.func @transform_1(%arg0: i32) -> (i32, i32, i32) {
    %c0_i32 = arith.constant 0 : i32
    %c0_i32_0 = arith.constant 0 : i32
    %c0_i32_1 = arith.constant 0 : i32
    return %arg0, %c0_i32, %c0_i32_0 : i32, i32, i32
  }
}

</mosaic_0001>

<bundles_post_ra>
// kernel: tpu_custom_call.1
= control target key start
LH: loop header
LB: loop body
LE: loop exit
PB: predicated region body
PF: predicated region fallthrough
CT: control target
= control target key end

     0   :  { %6 = vsyncpa [#allocation3], 0  ;;  %s350_s0 = inlined_call_operand.hbm [shape: f32[8,8,128], index: 0, kind: input, shape index: {}]   ;;  %s351_s1 = inlined_call_operand.hbm [shape: f32[1,1,128], index: 1, kind: output, shape index: {}]  }
   0x1   :  { %7 = vsyncpa [#allocation4], 0  ;;  %s12_s8 = sshll.u32 %s350_s0, 4  ;;  %s255_s9 = smov [#allocation2]   ;;  %s13_s8 = int_to_ptr.hbm [resolvable:$true] %s12_s8 }
   0x2   :  { %s14_s10 = sshll.u32 %s255_s9, 4  ;;  %s256_s11 = smov 128   ;;  %s15_s10 = int_to_ptr.vmem [resolvable:$true] %s14_s10 }
   0x3   :  { %s257_s12 = smov 8  }
   0x4   :  { %20 = dma.hbm_to_vmem [thread:$0]  %s13_s8, 1024, %s15_s10, [#allocation3], %s256_s11, %s256_s11, %s257_s12  }
   0x5   :  { %251 = dma.done.wait [#allocation3], 1024  }
   0x6   :  { %252 = vsyncadd [#allocation3], 4294966272  ;;  %v272_v0 = vld [vmem:[#allocation2] sm:$0xff]  ;;  %v274_v1 = vld [vmem:[#allocation2 + $0x10] sm:$0xff]  ;;  %s258_s0 = smov [#allocation5]   ;;  %s180_s16 = sshll.u32 %s351_s1, 4  ;;  %s181_s16 = int_to_ptr.hbm [resolvable:$true] %s180_s16 }
   0x7   :  { %v276_v2 = vld [vmem:[#allocation2 + $0x8] sm:$0xff]  ;;  %v278_v3 = vld [vmem:[#allocation2 + $0x18] sm:$0xff]  ;;  %v280_v4 = vld [vmem:[#allocation2 + $0x20] sm:$0xff]  ;;  %v51_v5 = vsub.f32 %v274_v1, %v272_v0  ;;  %s178_s13 = sshll.u32 %s258_s0, 4  ;;  %s179_s13 = int_to_ptr.vmem [resolvable:$true] %s178_s13 }
   0x8   :  { %v284_v6 = vld [vmem:[#allocation2 + $0x28] sm:$0xff]  ;;  %v286_v7 = vld [vmem:[#allocation2 + $0x30] sm:$0xff]  ;;  %v288_v8 = vld [vmem:[#allocation2 + $0x38] sm:$0xff]  ;;  %v52_v9 = vsub.f32 %v278_v3, %v276_v2  ;;  %v60_v10 = vmax.f32 %v272_v0, %v280_v4  ;;  %v80_v26 = vmin.f32 %v272_v0, %v280_v4 }
   0x9   :  { %v55_v11 = vsub.f32 %v286_v7, %v280_v4  ;;  %v56_v12 = vsub.f32 %v288_v8, %v284_v6  ;;  %v59_v14 = vmin.f32 %v274_v1, %v286_v7  ;;  %v63_v16 = vmin.f32 %v278_v3, %v288_v8 }
   0xa   :  { %v53_v13 = vmul.f32 %v52_v9, %v51_v5  ;;  %v64_v19 = vmax.f32 %v276_v2, %v284_v6  ;;  %v71_v21 = vadd.f32 %v286_v7, %v280_v4  ;;  %v75_v22 = vadd.f32 %v288_v8, %v284_v6 }
   0xb   :  { %v57_v15 = vmul.f32 %v56_v12, %v55_v11  ;;  %v61_v18 = vsub.f32 %v59_v14, %v60_v10  ;;  %v79_v23 = vmax.f32 %v274_v1, %v286_v7  ;;  %v82_v29 = vmax.f32 %v278_v3, %v288_v8 }
   0xc   :  { %v54_v17 = vand.u32 2147483647, %v53_v13  ;;  %v65_v25 = vsub.f32 %v63_v16, %v64_v19  ;;  %v72_v27 = vsub.f32 %v71_v21, %v274_v1  ;;  %v76_v28 = vsub.f32 %v75_v22, %v278_v3 }
   0xd   :  { %v58_v20 = vand.u32 2147483647, %v57_v15  ;;  %v62_v24 = vmax.f32 %v61_v18, 0.0  ;;  %v81_v32 = vsub.f32 %v79_v23, %v80_v26  ;;  %v83_v33 = vmin.f32 %v276_v2, %v284_v6 }
   0xe   :  { %v66_v30 = vmax.f32 %v65_v25, 0.0  ;;  %v73_v34 = vsub.f32 %v72_v27, %v272_v0  ;;  %v77_v35 = vsub.f32 %v76_v28, %v276_v2  ;;  %v41_v18 = vsub.f32 %v276_v2, %v284_v6 }
   0xf   :  { %v68_v31 = vadd.f32 %v58_v20, %v54_v17  ;;  %v84_v37 = vsub.f32 %v82_v29, %v83_v33  ;;  %v101_v38 = vmul.f32 %v81_v32, %v81_v32  ;;  %v40_v17 = vsub.f32 %v272_v0, %v280_v4 }
  0x10   :  { %v320_v36 = vmul.f32 %v66_v30, %v62_v24  ;;  %v74_v39 = vmul.f32 0.5, %v73_v34  ;;  %v78_v40 = vmul.f32 0.5, %v77_v35  ;;  %v152_v22 = vlaneseq }
  0x11   :  { %v102_v42 = vmul.f32 %v84_v37, %v84_v37  ;;  %v42_v0 = vsub.f32 %v274_v1, %v286_v7  ;;  %v44_v4 = vmul.f32 %v40_v17, %v40_v17  ;;  %v45_v2 = vmul.f32 %v41_v18, %v41_v18 }
  0x12   :  { %v69_v41 = vsub.f32 %v68_v31, %v320_v36  ;;  %v85_v43 = vmul.f32 %v74_v39, %v74_v39  ;;  %v86_v44 = vmul.f32 %v78_v40, %v78_v40  ;;  %v153_v29 = vshrl.u32 %v152_v22, 7 }
  0x13   :  { %v103_v46 = vadd.f32 %v102_v42, %v101_v38  ;;  %v43_v32 = vsub.f32 %v278_v3, %v288_v8  ;;  %v46_v1 = vadd.f32 %v45_v2, %v44_v4  ;;  %v47_v7 = vmul.f32 %v42_v0, %v42_v0 }
  0x14   :  { %v70_v45 = vmax.f32 %v69_v41, 0.0  ;;  %v323_v47 = vadd.f32 %v86_v44, %v85_v43  ;;  %v155_v38 = vand.u32 127, %v152_v22  ;;  %v159_v39 = vmul.u32 128, %v153_v29 }
  0x15   :  { %195 = vrsqrt.f32 %v103_v46  ;;  %vm111_vm0 = vcmp.eq.f32.partialorder %v103_v46, inf  ;;  %v114_v61 = vand.u32 2147483648, %v103_v46  ;;  %vm113_vm1 = vcmp.eq.f32.partialorder %v103_v46, 0.0 }
  0x16   :  { %197 = vrsqrt.f32 %v323_v47  ;;  %v117_v48 = vadd.f32 1e-06, %v70_v45  ;;  %vm95_vm5 = vcmp.eq.f32.partialorder %v323_v47, inf  ;;  %v98_v6 = vand.u32 2147483648, %v323_v47 }
  0x17   :  { %vm97_vm7 = vcmp.eq.f32.partialorder %v323_v47, 0.0  ;;  %v48_v42 = vadd.f32 %v47_v7, %v46_v1  ;;  %v49_v43 = vmul.f32 %v43_v32, %v43_v32 }
  0x18   :  { %199 = vrcp.f32 %v117_v48  ;;  %vm123_vm2 = vweird.f32 %v117_v48  ;;  %v129_v14 = vand.u32 2147483648, %v117_v48  ;;  %v127_v16 = vand.u32 2147483647, %v117_v48 }
  0x19   :  { %v50_v8 = vadd.f32 %v49_v43, %v48_v42 }
  0x1a   :  { %v130_v21 = vor.u32 1.1754944e-38, %v129_v14  ;;  %vm128_vm6 = vcmp.eq.f32.partialorder %v127_v16, 8.507059e+37 }
  0x1b   :  { %v196_v49 = vpop.eup %195 }
  0x1c   :  { %v198_v50 = vpop.eup %197  ;;  %v105_v51 = vmul.f32 %v196_v49, %v103_v46 }
  0x1d   :  { %v89_v52 = vmul.f32 %v198_v50, %v323_v47 }
  0x1e   :  { %v106_v53 = vmul.f32 %v196_v49, %v105_v51  ;;  %v200_v54 = vpop.eup %199 }
  0x1f   :  { %v90_v55 = vmul.f32 %v198_v50, %v89_v52  ;;  %v119_v57 = vmul.f32 %v200_v54, %v117_v48  ;;  %vm124_vm3 = vweird.f32 %v200_v54 }
  0x20   :  { %v107_v56 = vmul.f32 0.5, %v106_v53  ;;  %vm331_vm4 = vmor %vm123_vm2, %vm124_vm3 }
  0x21   :  { %v91_v59 = vmul.f32 0.5, %v90_v55  ;;  %v120_v62 = vsub.f32 1.0, %v119_v57 }
  0x22   :  { %v108_v58 = vsub.f32 1.5, %v107_v56 }
  0x23   :  { %v92_v5 = vsub.f32 1.5, %v91_v59  ;;  %v121_v11 = vmul.f32 %v200_v54, %v120_v62 }
  0x24   :  { %v109_v60 = vmul.f32 %v196_v49, %v108_v58 }
  0x25   :  { %v93_v13 = vmul.f32 %v198_v50, %v92_v5  ;;  %v122_v15 = vadd.f32 %v200_v54, %v121_v11 }
  0x26   :  { %v110_v63 = vmul.f32 %v109_v60, %v103_v46 }
  0x27   :  { %v94_v20 = vmul.f32 %v93_v13, %v323_v47  ;;  %v126_v23 = vsel %vm331_vm4, %v200_v54, %v122_v15 }
  0x28   :  { %v112_v9 = vsel %vm111_vm0, %v103_v46, %v110_v63  ;;  %v131_v27 = vsel %vm128_vm6, %v130_v21, %v126_v23 }
  0x29   :  { %v115_v10 = vsel %vm113_vm1, %v114_v61, %v112_v9  ;;  %v96_v25 = vsel %vm95_vm5, %v323_v47, %v94_v20  ;;  %v132_v34 = vmul.f32 %v131_v27, %v320_v36  ;;  %v160_v47 = vadd.s32 %v159_v39, %v155_v38 }
  0x2a   :  { %v116_v12 = vmax.f32 %v115_v10, 1e-06  ;;  %v99_v33 = vsel %vm97_vm7, %v98_v6, %v96_v25  ;;  %v163_v36 = vmul.f32 1.5625e-06, %v50_v8 }
  0x2b   :  { %v100_v40 = vmax.f32 %v99_v33, 1e-06  ;;  %v133_v44 = vsub.f32 1.0, %v132_v34  ;;  %vm161_vm12 = vcmp.lt.s32.totalorder %v160_v47, 400 }
  0x2c   :  { %201 = vrcp.f32 %v116_v12  ;;  %v145_v28 = vand.u32 2147483648, %v116_v12  ;;  %vm139_vm8 = vweird.f32 %v116_v12  ;;  %v143_v31 = vand.u32 2147483647, %v116_v12 }
  0x2e   :  { %v146_v37 = vor.u32 1.1754944e-38, %v145_v28  ;;  %vm144_vm11 = vcmp.eq.f32.partialorder %v143_v31, 8.507059e+37 }
  0x32   :  { %v202_v24 = vpop.eup %201 }
  0x33   :  { %v135_v26 = vmul.f32 %v202_v24, %v116_v12  ;;  %vm140_vm9 = vweird.f32 %v202_v24 }
  0x34   :  { %vm141_vm10 = vmor %vm139_vm8, %vm140_vm9 }
  0x35   :  { %v136_v30 = vsub.f32 1.0, %v135_v26 }
  0x37   :  { %v137_v35 = vmul.f32 %v202_v24, %v136_v30 }
  0x39   :  { %v138_v41 = vadd.f32 %v202_v24, %v137_v35 }
  0x3b   :  { %v142_v45 = vsel %vm141_vm10, %v202_v24, %v138_v41 }
  0x3c   :  { %v147_v46 = vsel %vm144_vm11, %v146_v37, %v142_v45 }
  0x3d   :  { %v148_v3 = vmul.f32 %v147_v46, %v100_v40 }
  0x3f   :  { %v149_v48 = vadd.f32 %v148_v3, %v133_v44 }
  0x41   :  { %v190_v49 = vclamps-f32 %v149_v48, 1.0 }
  0x43   :  { %v162_v50 = vsel %vm161_vm12, %v190_v49, 0.0 }
  0x44   :  { %v164_v51 = vmul.f32 0.001875, %v162_v50 }
  0x46   :  { %v165_v52 = vadd.f32 %v164_v51, %v163_v36 }
  0x48   :  { %v166_v53 = vrot.slane %v165_v52, 4 }
  0x4a   :  { %v167_v54 = vadd.f32 %v166_v53, %v165_v52 }
  0x4c   :  { %v168_v55 = vrot.slane %v167_v54, 2 }
  0x4e   :  { %v169_v56 = vadd.f32 %v168_v55, %v167_v54 }
  0x50   :  { %v170_v57 = vrot.slane %v169_v56, 1 }
  0x52   :  { %v171_v58 = vadd.f32 %v170_v57, %v169_v56 }
  0x54   :  { %172 = vst [vmem:[#allocation5] sm:$0x1] %v171_v58 }
  0x55   :  { %183 = dma.vmem_to_hbm [thread:$0]  %s179_s13, 16, %s181_s16, [#allocation4]  }
  0x56   :  { %253 = dma.done.wait [#allocation4], 16  }
  0x57   :  { %254 = vsyncadd [#allocation4], 4294967280 }
  0x58   :  { %188 = vsyncpa [#allocation3], 1 }
  0x59   :  { %189 = vsyncpa [#allocation4], 1 }

</bundles_post_ra>
